<compile_context>
chip_gen: v6e
topology: v6e:2x2x1
jax: 0.10.0
libtpu: 0.0.40
codegen_flags: <defaults>
</compile_context>

<pallas_src>
import jax
import jax.numpy as jnp
from jax.experimental import pallas as pl
from jax.experimental.pallas import tpu as pltpu


def _diffusion_kernel(x0_ref, noise_ref, ca_ref, cb_ref, wblk_ref, bvec_ref,
                      xt_ref, sse_ref):
    x0 = x0_ref[...]            # (B*C, HW) packed: all 8 sublanes used
    nz = noise_ref[...]         # (B*C, HW)

    # forward diffusion: x_t = sqrt(ab)[t] * x_0 + sqrt(1-ab)[t] * noise
    # ca/cb are per-row (B*C, 1) vectors -> single lane-broadcast FMA chain (VPU)
    xt = ca_ref[...] * x0 + cb_ref[...] * nz
    xt_ref[...] = xt.astype(xt_ref.dtype)

    # synthetic noise-prediction model: block-diagonal 1x1 conv over channels
    # (all B images batched into one dot) + precomputed (bias + time-bias) vector
    pred = jnp.dot(wblk_ref[...], xt, preferred_element_type=jnp.float32)
    pred = pred + bvec_ref[...]

    diff = pred - nz
    # single write, no cross-step accumulation
    sse_ref[...] = jnp.sum(diff * diff).reshape(1, 1)


def gaussian_diffusion_trainer_forward(x_0, t, noise, w, bias, tbias,
                                       beta_1, beta_T, T):
    """Returns (t, noise, x_t, loss) matching the PyTorch module semantics."""
    B, C, H, W = x_0.shape
    HW = H * W
    BC = B * C

    # diffusion schedule buffers (glue, plain JAX)
    betas = jnp.linspace(beta_1, beta_T, T, dtype=jnp.float32)
    alphas = 1.0 - betas
    alphas_bar = jnp.cumprod(alphas, axis=0)
    sqrt_alphas_bar = jnp.sqrt(alphas_bar)
    sqrt_one_minus_alphas_bar = jnp.sqrt(1.0 - alphas_bar)

    t = t.astype(jnp.int32)

    # Gather per-batch coefficients in the wrapper (trivial XLA gather) and
    # expand to per-row (B*C, 1) vectors: no SMEM tables, no dynamic in-kernel
    # scalar loads, broadcasts hoisted out of the kernel.
    ca_vec = jnp.repeat(sqrt_alphas_bar[t], C).reshape(BC, 1)
    cb_vec = jnp.repeat(sqrt_one_minus_alphas_bar[t], C).reshape(BC, 1)
    bvec = (jnp.tile(bias.reshape(C), B) + jnp.repeat(tbias[t], C)).reshape(BC, 1)

    # Block-diagonal weight batches the per-image 1x1 conv into a single dot.
    wblk = jnp.kron(jnp.eye(B, dtype=w.dtype), w)          # (B*C, B*C)

    x0_p = x_0.reshape(BC, HW)
    nz_p = noise.reshape(BC, HW)

    xt_p, sse = pl.pallas_call(
        _diffusion_kernel,
        grid=(1,),                                          # single invocation
        in_specs=[
            pl.BlockSpec((BC, HW), lambda i: (0, 0)),       # x_0 packed
            pl.BlockSpec((BC, HW), lambda i: (0, 0)),       # noise packed
            pl.BlockSpec((BC, 1), lambda i: (0, 0)),        # sqrt(ab)[t] per row
            pl.BlockSpec((BC, 1), lambda i: (0, 0)),        # sqrt(1-ab)[t] per row
            pl.BlockSpec((BC, BC), lambda i: (0, 0)),       # block-diag weight
            pl.BlockSpec((BC, 1), lambda i: (0, 0)),        # bias + time bias
        ],
        out_specs=[
            pl.BlockSpec((BC, HW), lambda i: (0, 0)),       # x_t packed
            pl.BlockSpec((1, 1), lambda i: (0, 0)),         # sum of squared errors
        ],
        out_shape=[
            jax.ShapeDtypeStruct((BC, HW), jnp.float32),
            jax.ShapeDtypeStruct((1, 1), jnp.float32),
        ],
        compiler_params=pltpu.CompilerParams(
            dimension_semantics=("arbitrary",)),
    )(x0_p, nz_p, ca_vec, cb_vec, wblk, bvec)

    x_t = xt_p.reshape(B, C, H, W)
    loss = sse[0, 0] / (B * C * H * W)                      # MSE, reduction='mean'
    return t, noise, x_t, loss


if __name__ == "__main__":
    B, C, H, W = 2, 4, 16, 16
    T = 1000
    beta_1, beta_T = 1e-4, 0.02

    key = jax.random.PRNGKey(0)
    k_x, k_t, k_n = jax.random.split(key, 3)

    # forward() inputs: x_0 plus the randomness it draws internally
    # (t ~ randint(T), noise ~ randn_like(x_0)) made deterministic here.
    x_0 = jax.random.normal(k_x, (B, C, H, W), dtype=jnp.float32)
    t = jax.random.randint(k_t, (B,), 0, T, dtype=jnp.int32)
    noise = jax.random.normal(k_n, (B, C, H, W), dtype=jnp.float32)

    # deterministic synthetic model parameters
    # TODO(synk): the real `model` (a UNet) is an external module; a 1x1-conv
    #             + time-bias stand-in is used so the hot path stays in-kernel.
    w = (jnp.arange(C * C, dtype=jnp.float32).reshape(C, C) / (C * C) - 0.5) * 0.2
    bias = jnp.linspace(-0.1, 0.1, C, dtype=jnp.float32).reshape(C, 1)
    tbias = 0.01 * jnp.sin(jnp.arange(T, dtype=jnp.float32) / T * 6.28318)

    t_out, noise_out, x_t, loss = gaussian_diffusion_trainer_forward(
        x_0, t, noise, w, bias, tbias, beta_1, beta_T, T)

    jax.block_until_ready((t_out, noise_out, x_t, loss))
    assert x_t.shape == (B, C, H, W)
    assert loss.shape == ()
    print("KERNEL_OK")
</pallas_src>

<mosaic_0001>
module attributes {stable_mosaic.version = 11 : i64} {
  func.func @_diffusion_kernel(%arg0: i32, %arg1: memref<8x256xf32, #tpu.memory_space<vmem>>, %arg2: memref<8x256xf32, #tpu.memory_space<vmem>>, %arg3: memref<8x1xf32, #tpu.memory_space<vmem>>, %arg4: memref<8x1xf32, #tpu.memory_space<vmem>>, %arg5: memref<8x8xf32, #tpu.memory_space<vmem>>, %arg6: memref<8x1xf32, #tpu.memory_space<vmem>>, %arg7: memref<8x256xf32, #tpu.memory_space<vmem>>, %arg8: memref<1x1xf32, #tpu.memory_space<vmem>>) attributes {dimension_semantics = [#tpu.dimension_semantics<arbitrary>], iteration_bounds = array<i64: 1>, scalar_prefetch = 0 : i64, scratch_operands = 0 : i64, tpu.core_type = #tpu.core_type<tc>, window_params = [{pipeline_mode = #tpu.pipeline_mode<synchronous>, transform_indices = @transform_0, window_bounds = array<i64: 8, 256>}, {pipeline_mode = #tpu.pipeline_mode<synchronous>, transform_indices = @transform_1, window_bounds = array<i64: 8, 256>}, {pipeline_mode = #tpu.pipeline_mode<synchronous>, transform_indices = @transform_2, window_bounds = array<i64: 8, 1>}, {pipeline_mode = #tpu.pipeline_mode<synchronous>, transform_indices = @transform_3, window_bounds = array<i64: 8, 1>}, {pipeline_mode = #tpu.pipeline_mode<synchronous>, transform_indices = @transform_4, window_bounds = array<i64: 8, 8>}, {pipeline_mode = #tpu.pipeline_mode<synchronous>, transform_indices = @transform_5, window_bounds = array<i64: 8, 1>}, {pipeline_mode = #tpu.pipeline_mode<synchronous>, transform_indices = @transform_6, window_bounds = array<i64: 8, 256>}, {pipeline_mode = #tpu.pipeline_mode<synchronous>, transform_indices = @transform_7, window_bounds = array<i64: 1, 1>}]} {
    %c0 = arith.constant 0 : index
    %c0_0 = arith.constant 0 : index
    %0 = vector.load %arg1[%c0, %c0_0] : memref<8x256xf32, #tpu.memory_space<vmem>>, vector<8x256xf32>
    %c0_1 = arith.constant 0 : index
    %c0_2 = arith.constant 0 : index
    %1 = vector.load %arg2[%c0_1, %c0_2] : memref<8x256xf32, #tpu.memory_space<vmem>>, vector<8x256xf32>
    %c0_3 = arith.constant 0 : index
    %c0_4 = arith.constant 0 : index
    %2 = vector.load %arg3[%c0_3, %c0_4] : memref<8x1xf32, #tpu.memory_space<vmem>>, vector<8x1xf32>
    %3 = vector.broadcast %2 : vector<8x1xf32> to vector<8x256xf32>
    %4 = arith.mulf %3, %0 : vector<8x256xf32>
    %c0_5 = arith.constant 0 : index
    %c0_6 = arith.constant 0 : index
    %5 = vector.load %arg4[%c0_5, %c0_6] : memref<8x1xf32, #tpu.memory_space<vmem>>, vector<8x1xf32>
    %6 = vector.broadcast %5 : vector<8x1xf32> to vector<8x256xf32>
    %7 = arith.mulf %6, %1 : vector<8x256xf32>
    %8 = arith.addf %4, %7 : vector<8x256xf32>
    %c0_7 = arith.constant 0 : index
    %c0_8 = arith.constant 0 : index
    %9 = vector.load %arg7[%c0_7, %c0_8] : memref<8x256xf32, #tpu.memory_space<vmem>>, vector<8x256xf32>
    tpu.vector_store %arg7[%c0_7, %c0_8], %8 {strides = array<i32>} : memref<8x256xf32, #tpu.memory_space<vmem>>, vector<8x256xf32>,
    %c0_9 = arith.constant 0 : index
    %c0_10 = arith.constant 0 : index
    %10 = vector.load %arg5[%c0_9, %c0_10] : memref<8x8xf32, #tpu.memory_space<vmem>>, vector<8x8xf32>
    %cst = arith.constant dense<0.000000e+00> : vector<8x256xf32>
    %11 = tpu.matmul %10, %8, %cst {dimension_numbers = #tpu.dot_dimension_numbers<[1], [0], [0], [1], [0, 0, 1, 1], [], []>} : vector<8x8xf32>, vector<8x256xf32>, vector<8x256xf32> -> vector<8x256xf32>
    %c0_11 = arith.constant 0 : index
    %c0_12 = arith.constant 0 : index
    %12 = vector.load %arg6[%c0_11, %c0_12] : memref<8x1xf32, #tpu.memory_space<vmem>>, vector<8x1xf32>
    %13 = vector.broadcast %12 : vector<8x1xf32> to vector<8x256xf32>
    %14 = arith.addf %11, %13 : vector<8x256xf32>
    %15 = arith.subf %14, %1 : vector<8x256xf32>
    %16 = arith.mulf %15, %15 : vector<8x256xf32>
    %17 = vector.shape_cast %16 : vector<8x256xf32> to vector<1x8x256xf32>
    %cst_13 = arith.constant dense<0.000000e+00> : vector<1xf32>
    %18 = vector.multi_reduction <add>, %17, %cst_13 [1, 2] : vector<1x8x256xf32> to vector<1xf32>
    %19 = vector.shape_cast %18 : vector<1xf32> to vector<1x1x1xf32>
    %20 = vector.extract %19[0, 0, 0] : f32 from vector<1x1x1xf32>
    %21 = vector.broadcast %20 : f32 to vector<1x1xf32>
    %c0_14 = arith.constant 0 : index
    %c0_15 = arith.constant 0 : index
    %22 = vector.load %arg8[%c0_14, %c0_15] : memref<1x1xf32, #tpu.memory_space<vmem>>, vector<1x1xf32>
    tpu.vector_store %arg8[%c0_14, %c0_15], %21 {strides = array<i32>} : memref<1x1xf32, #tpu.memory_space<vmem>>, vector<1x1xf32>,
    return
  }
  func.func @transform_0(%arg0: i32) -> (i32, i32) {
    %c0_i32 = arith.constant 0 : i32
    %c0_i32_0 = arith.constant 0 : i32
    %c0_i32_1 = arith.constant 0 : i32
    return %c0_i32, %c0_i32_0 : i32, i32
  }
  func.func @transform_1(%arg0: i32) -> (i32, i32) {
    %c0_i32 = arith.constant 0 : i32
    %c0_i32_0 = arith.constant 0 : i32
    %c0_i32_1 = arith.constant 0 : i32
    return %c0_i32, %c0_i32_0 : i32, i32
  }
  func.func @transform_2(%arg0: i32) -> (i32, i32) {
    %c0_i32 = arith.constant 0 : i32
    %c0_i32_0 = arith.constant 0 : i32
    %c0_i32_1 = arith.constant 0 : i32
    return %c0_i32, %c0_i32_0 : i32, i32
  }
  func.func @transform_3(%arg0: i32) -> (i32, i32) {
    %c0_i32 = arith.constant 0 : i32
    %c0_i32_0 = arith.constant 0 : i32
    %c0_i32_1 = arith.constant 0 : i32
    return %c0_i32, %c0_i32_0 : i32, i32
  }
  func.func @transform_4(%arg0: i32) -> (i32, i32) {
    %c0_i32 = arith.constant 0 : i32
    %c0_i32_0 = arith.constant 0 : i32
    %c0_i32_1 = arith.constant 0 : i32
    return %c0_i32, %c0_i32_0 : i32, i32
  }
  func.func @transform_5(%arg0: i32) -> (i32, i32) {
    %c0_i32 = arith.constant 0 : i32
    %c0_i32_0 = arith.constant 0 : i32
    %c0_i32_1 = arith.constant 0 : i32
    return %c0_i32, %c0_i32_0 : i32, i32
  }
  func.func @transform_6(%arg0: i32) -> (i32, i32) {
    %c0_i32 = arith.constant 0 : i32
    %c0_i32_0 = arith.constant 0 : i32
    %c0_i32_1 = arith.constant 0 : i32
    return %c0_i32, %c0_i32_0 : i32, i32
  }
  func.func @transform_7(%arg0: i32) -> (i32, i32) {
    %c0_i32 = arith.constant 0 : i32
    %c0_i32_0 = arith.constant 0 : i32
    %c0_i32_1 = arith.constant 0 : i32
    return %c0_i32, %c0_i32_0 : i32, i32
  }
}

</mosaic_0001>

<bundles_post_ra>
// kernel: tpu_custom_call.1
= control target key start
LH: loop header
LB: loop body
LE: loop exit
PB: predicated region body
PF: predicated region fallthrough
CT: control target
= control target key end

     0   :  { %13 = vsyncpa [#allocation3], 0  ;;  %s339_s0 = inlined_call_operand.vmem [shape: f32[8,256], index: 0, kind: input, shape index: {}]   ;;  %s340_s1 = inlined_call_operand.hbm [shape: f32[8,256], index: 1, kind: input, shape index: {}]   ;;  %s341_s2 = inlined_call_operand.vmem [shape: f32[8,1], index: 2, kind: input, shape index: {}]   ;;  %s342_s3 = inlined_call_operand.vmem [shape: f32[8,1], index: 3, kind: input, shape index: {}]   ;;  %s343_s4 = inlined_call_operand.vmem [shape: f32[8,8], index: 4, kind: input, shape index: {}]   ;;  %s344_s5 = inlined_call_operand.vmem [shape: f32[8,1], index: 5, kind: input, shape index: {}]   ;;  %s345_s6 = inlined_call_operand.hbm [shape: f32[8,256], index: 6, kind: output, shape index: {0}]   ;;  %s346_s7 = inlined_call_operand.hbm [shape: f32[1,1], index: 7, kind: output, shape index: {1}]  }
   0x1   :  { %14 = vsyncpa [#allocation4], 0 }
   0x2   :  { %15 = vsyncpa [#allocation7], 0  ;;  %s267_s24 = smov [#allocation2]  }
   0x3   :  { %s24_s25 = sshll.u32 %s267_s24, 4  ;;  %s25_s25 = int_to_ptr.vmem [resolvable:$true] %s24_s25 }
   0x4   :  { %s209_s26 = scalar_lea.vmem %s25_s25, 256  ;;  %p214_p1 = scmp.lt.s32.totalorder %s25_s25, %s25_s25 }
   0x5   :  { %p210_p0 = scmp.ne.s32.totalorder %s25_s25, %s209_s26  ;;  %p215_p2 = scmp.lt.s32.totalorder %s209_s26, %s209_s26 }
   0x7   :  { %p216_p3 = por %p215_p2, %p214_p1 }
   0x9   :  { %p217_p4 = pnand %p216_p3, %p210_p0 }
   0xb   :  { %220 = shalt.err (!%p217_p4)
}
   0xc   :  { %27 = dma.hbm_to_vmem [thread:$0]  %s340_s1, 256, %s25_s25, [#allocation3]  }
   0xd   :  { %261 = dma.done.wait [#allocation3], 256  }
   0xe   :  { %262 = vsyncadd [#allocation3], 4294967040  ;;  %v268_v0 = vmov 0   ;;  %v43_v1 = vld [vmem:[%s341_s2] sm:$0xff]  ;;  %v269_v3 = vmov 0.0   ;;  %v40_v7 = vld [vmem:[%s339_s0 + $0x8] sm:$0xff] }
   0xf   :  { %199 = vset.pattern.permute.xlu0 %v268_v0  ;;  %200 = vset.pattern.permute.xlu1 %v268_v0  ;;  %v51_v2 = vld [vmem:[%s342_s3] sm:$0xff]  ;;  %v42_v9 = vld [vmem:[#allocation2 + $0x8] sm:$0xff]  ;;  %vm70_vm0 = vcmask 64512  }
  0x10   :  { %46 = vperm.xlu0 %199, %v43_v1   ;;  %138 = vmatprep.mubr.f32.mxu0 %v269_v3  ;;  %v64_v4 = vld [vmem:[%s344_s5] sm:$0xff] }
  0x11   :  { %67 = vperm.xlu1 %200, %v64_v4   ;;  %v39_v6 = vld [vmem:[%s339_s0] sm:$0xff]  ;;  %s270_s0 = smov [#allocation5]  }
  0x12   :  { %v41_v8 = vld [vmem:[#allocation2] sm:$0xff]  ;;  %s168_s14 = sshll.u32 %s270_s0, 4  ;;  %s169_s14 = int_to_ptr.vmem [resolvable:$true] %s168_s14 }
  0x13   :  { %v63_v17 = vld [vmem:[%s343_s4] sm:$0xff]  ;;  %s221_s4 = scalar_lea.vmem %s169_s14, 256  ;;  %p226_p6 = scmp.lt.s32.totalorder %s169_s14, %s169_s14 }
  0x14   :  { %54 = vperm.xlu0 %199, %v51_v2   ;;  %p222_p5 = scmp.ne.s32.totalorder %s169_s14, %s221_s4  ;;  %p227_p7 = scmp.lt.s32.totalorder %s221_s4, %s221_s4 }
  0x16   :  { %p228_p8 = por %p227_p7, %p226_p6 }
  0x18   :  { %p229_p9 = pnand %p228_p8, %p222_p5 }
  0x8b   :  { %v47_v5 = vpop.permute.xlu0 %46 }
  0x8c   :  { %v49_v11 = vmul.f32 %v47_v5, %v39_v6  ;;  %v50_v12 = vmul.f32 %v47_v5, %v40_v7  ;;  %v68_v18 = vpop.permute.xlu1 %67 }
  0x8f   :  { %v55_v10 = vpop.permute.xlu0 %54 }
  0x90   :  { %v57_v13 = vmul.f32 %v55_v10, %v41_v8  ;;  %v58_v14 = vmul.f32 %v55_v10, %v42_v9 }
  0x92   :  { %v60_v15 = vadd.f32 %v58_v14, %v50_v12  ;;  %v59_v16 = vadd.f32 %v57_v13, %v49_v11 }
  0x94   :  { %104 = vmatprep.subr.mxu0 %v60_v15  ;;  %62 = vst [vmem:[#allocation5 + $0x8] sm:$0xff] %v60_v15  ;;  %61 = vst [vmem:[#allocation5] sm:$0xff] %v59_v16 }
  0x95   :  { %105 = vmatpush1.msra.mxu0 %v59_v16 }
  0x96   :  { %191 = vmatmul.mubr.msk.f32.vlgmr.msra.gmra.mxu0 %vm70_vm0, %v63_v17 }
 0x156   :  { %v140_v19 = vpop.f32.mrf.mxu0 }
 0x157   :  { %v141_v20 = vadd.f32 %v140_v19, %v68_v18 }
 0x158   :  { %v142_v21 = vpop.f32.mrf.mxu0 }
 0x159   :  { %v145_v22 = vsub.f32 %v141_v20, %v41_v8  ;;  %v143_v23 = vadd.f32 %v142_v21, %v68_v18 }
 0x15b   :  { %v146_v24 = vsub.f32 %v143_v23, %v42_v9  ;;  %v147_v25 = vmul.f32 %v145_v22, %v145_v22 }
 0x15d   :  { %v148_v26 = vmul.f32 %v146_v24, %v146_v24 }
 0x15f   :  { %v149_v27 = vadd.f32 %v148_v26, %v147_v25 }
 0x161   :  { %150 = vadd.xlane.f32.xlu1 %v149_v27 }
 0x162   :  { %232 = shalt.err (!%p229_p9)
}
 0x163   :  { %171 = dma.vmem_to_hbm [thread:$0]  %s169_s14, 256, %s345_s6, [#allocation4]   ;;  %vm160_vm1 = vcmask 0  }
 0x164   :  { %s271_s17 = smov [#allocation6]  }
 0x165   :  { %s178_s18 = sshll.u32 %s271_s17, 4  ;;  %s179_s18 = int_to_ptr.vmem [resolvable:$true] %s178_s18 }
 0x166   :  { %s241_s20 = scalar_lea.vmem %s179_s18, 16  ;;  %s245_s21 = scalar_lea.vmem %s179_s18, 32 }
 0x167   :  { %p242_p10 = scmp.ne.s32.totalorder %s179_s18, %s241_s20  ;;  %p246_p11 = scmp.lt.s32.totalorder %s179_s18, %s179_s18 }
 0x168   :  { %p247_p12 = scmp.lt.s32.totalorder %s245_s21, %s241_s20 }
 0x16a   :  { %p248_p13 = por %p247_p12, %p246_p11 }
 0x16c   :  { %p249_p0 = pnand %p248_p13, %p242_p10 }
 0x1ea   :  { %v151_v28 = vpop.xlane.xlu1 %150 }
 0x1eb   :  { %v152_v29 = vrot.slane %v151_v28, 4 }
 0x1ed   :  { %v153_v30 = vadd.f32 %v152_v29, %v151_v28 }
 0x1ef   :  { %v154_v31 = vrot.slane %v153_v30, 2 }
 0x1f1   :  { %v155_v32 = vadd.f32 %v154_v31, %v153_v30 }
 0x1f3   :  { %v156_v33 = vrot.slane %v155_v32, 1 }
 0x1f5   :  { %v157_v34 = vadd.f32 %v156_v33, %v155_v32 }
 0x1f7   :  { %192 = vpush %v157_v34 }
 0x228   :  { %s193_s19 = spop %192 }
 0x229   :  { %v159_v35 = vstv %s193_s19 }
 0x22a   :  { %161 = vst.msk [vmem:[#allocation6] sm:$0x1] %vm160_vm1, %v159_v35 }
 0x22b   :  { %252 = shalt.err (!%p249_p0)
}
 0x22c   :  { %181 = dma.vmem_to_hbm [thread:$0]  %s179_s18, 16, %s346_s7, [#allocation7]  }
 0x22d   :  { %263 = dma.done.wait [#allocation4], 256  }
 0x22e   :  { %264 = vsyncadd [#allocation4], 4294967040 }
 0x22f   :  { %265 = dma.done.wait [#allocation7], 16  }
 0x230   :  { %266 = vsyncadd [#allocation7], 4294967280 }
 0x231   :  { %188 = vsyncpa [#allocation3], 1 }
 0x232   :  { %189 = vsyncpa [#allocation4], 1 }
 0x233   :  { %190 = vsyncpa [#allocation7], 1 }

</bundles_post_ra>
